<compile_context>
chip_gen: v7x
topology: tpu7x:2x2x1
jax: 0.10.0
libtpu: 0.0.40
codegen_flags: <defaults>
</compile_context>

<pallas_src>
import functools

import jax
import jax.numpy as jnp
import numpy as np
from jax.experimental import pallas as pl
from jax.experimental.pallas import tpu as pltpu


def nearest_neighbours(locs_in, locs_out, k):
    """For every output location, the indices of its k nearest input locations.
    Returns shape (k, N_out) so that x[:, :, neighbours] -> (B, C, k, N_out)."""
    d2 = np.sum((locs_out[:, None, :] - locs_in[None, :, :]) ** 2, axis=-1)  # (N_out, N_in)
    idx = np.argsort(d2, axis=-1)[:, :k]                                     # (N_out, k)
    return np.ascontiguousarray(idx.T).astype(np.int32)                      # (k, N_out)


def _ceil_to(v, m):
    return ((v + m - 1) // m) * m


def _pick_tile(dim, max_tile, quantum):
    """Pick a (tile, padded_dim) pair: tile is a multiple of `quantum`, divides
    padded_dim exactly, and is at most max_tile (which must be a multiple of
    quantum)."""
    assert max_tile % quantum == 0
    padded_min = _ceil_to(dim, quantum)
    if padded_min <= max_tile:
        return padded_min, padded_min
    return max_tile, _ceil_to(dim, max_tile)


def _avgpool_matmul_kernel(x_ref, w_ref, o_ref, acc_ref, *, inv_k):
    # x_ref: (tm, tk)  w_ref: (tk, tn)  o_ref: (tm, tn)  acc_ref: (tm, tn) f32
    @pl.when(pl.program_id(2) == 0)
    def _init():
        acc_ref[...] = jnp.zeros_like(acc_ref)

    acc_ref[...] += jnp.dot(
        x_ref[...], w_ref[...], preferred_element_type=jnp.float32
    )

    @pl.when(pl.program_id(2) == pl.num_programs(2) - 1)
    def _finalize():
        # sum over the k neighbours -> mean (inv_k is a static Python float)
        o_ref[...] = (acc_ref[...] * inv_k).astype(o_ref.dtype)


def avg_pool_nn(x, neighbours, *, use_bf16=False,
                max_tile_m=256, max_tile_n=512, max_tile_k=512):
    """x: (B, C, N_in) float32, neighbours: (k, N_out) int32 -> (B, C, N_out)."""
    B, C, N_in = x.shape
    k, N_out = neighbours.shape
    BC = B * C

    # --- wrapper-side preprocessing (neighbours are static module state) ------
    # Pooling matrix of integer neighbour counts: W[n, m] = #{j : nbr[j,m] == n}.
    counts = jnp.sum(jax.nn.one_hot(neighbours, N_in, dtype=jnp.float32), axis=0)  # (N_out, N_in)
    w = counts.T                                                                   # (N_in, N_out)
    x2 = x.reshape(BC, N_in)

    if use_bf16:
        # Counts are small integers -> exact in bf16; only x is rounded
        # (accuracy tradeoff vs the f32 torch reference, gated on purpose).
        x2 = x2.astype(jnp.bfloat16)
        w = w.astype(jnp.bfloat16)

    # --- tiling / padding ------------------------------------------------------
    tm, M = _pick_tile(BC, max_tile_m, 8)        # sublane axis of x / out
    tn, N = _pick_tile(N_out, max_tile_n, 128)   # lane axis of out (>=128 => unmasked stores)
    tk, K = _pick_tile(N_in, max_tile_k, 128)    # contraction axis

    # Zero-pad so every block is in-bounds; K padding MUST be real zeros so the
    # tiled accumulation stays exact. Pad rows/cols of out are sliced off below.
    x_p = jnp.pad(x2, ((0, M - BC), (0, K - N_in)))
    w_p = jnp.pad(w, ((0, K - N_in), (0, N - N_out)))

    kernel = functools.partial(_avgpool_matmul_kernel, inv_k=1.0 / float(k))

    out_p = pl.pallas_call(
        kernel,
        out_shape=jax.ShapeDtypeStruct((M, N), jnp.float32),
        grid_spec=pltpu.PrefetchScalarGridSpec(
            num_scalar_prefetch=0,
            grid=(M // tm, N // tn, K // tk),
            in_specs=[
                pl.BlockSpec((tm, tk), lambda i, j, kk: (i, kk)),
                pl.BlockSpec((tk, tn), lambda i, j, kk: (kk, j)),
            ],
            out_specs=pl.BlockSpec((tm, tn), lambda i, j, kk: (i, j)),
            scratch_shapes=[pltpu.VMEM((tm, tn), jnp.float32)],
        ),
        compiler_params=pltpu.CompilerParams(
            # Independent axes parallel (megacore / 2-TC sharding), reduction
            # axis arbitrary. Tiles are sized so the double-buffered working
            # set (~5 MiB f32 at max tiles) fits every generation's default
            # scoped VMEM, including v7x's 64 MiB physical VMEM.
            dimension_semantics=("parallel", "parallel", "arbitrary"),
        ),
    )(x_p, w_p)

    return out_p[:BC, :N_out].reshape(B, C, N_out)


if __name__ == "__main__":
    B, C, N_in, N_out, k = 2, 4, 64, 32, 4

    key = jax.random.PRNGKey(0)
    k1, k2, k3 = jax.random.split(key, 3)

    # deterministic synthetic "locations" (2-D coords) and input features
    locs_in = np.asarray(jax.random.uniform(k1, (N_in, 2), jnp.float32))
    locs_out = np.asarray(jax.random.uniform(k2, (N_out, 2), jnp.float32))
    neighbours = jnp.asarray(nearest_neighbours(locs_in, locs_out, k))  # (k, N_out) i32
    x = jax.random.normal(k3, (B, C, N_in), jnp.float32)

    # pure-JAX reference of the PyTorch forward: gather then mean over k
    ref = jnp.mean(x[:, :, neighbours], axis=-2)

    # f32 path (bit-accurate up to f32 matmul rounding)
    out = jax.block_until_ready(avg_pool_nn(x, neighbours, use_bf16=False))
    assert out.shape == (B, C, N_out)
    np.testing.assert_allclose(np.asarray(out), np.asarray(ref), rtol=1e-5, atol=1e-5)

    # bf16 MXU fast path (gated accuracy tradeoff: x rounded to bf16)
    out_bf16 = jax.block_until_ready(avg_pool_nn(x, neighbours, use_bf16=True))
    np.testing.assert_allclose(np.asarray(out_bf16), np.asarray(ref), rtol=5e-2, atol=5e-2)

    print("KERNEL_OK")
</pallas_src>

<mosaic_0001>
module attributes {stable_mosaic.version = 11 : i64} {
  func.func @_avgpool_matmul_kernel(%arg0: i32, %arg1: i32, %arg2: i32, %arg3: memref<8x128xf32, #tpu.memory_space<vmem>>, %arg4: memref<128x128xf32, #tpu.memory_space<vmem>>, %arg5: memref<8x128xf32, #tpu.memory_space<vmem>>, %arg6: memref<8x128xf32, #tpu.memory_space<vmem>>) attributes {dimension_semantics = [#tpu.dimension_semantics<parallel>, #tpu.dimension_semantics<parallel>, #tpu.dimension_semantics<arbitrary>], iteration_bounds = array<i64: 1, 1, 1>, scalar_prefetch = 0 : i64, scratch_operands = 1 : i64, tpu.core_type = #tpu.core_type<tc>, window_params = [{transform_indices = @transform_0, window_bounds = array<i64: 8, 128>}, {transform_indices = @transform_1, window_bounds = array<i64: 128, 128>}, {transform_indices = @transform_2, window_bounds = array<i64: 8, 128>}]} {
    %c0_i32 = arith.constant 0 : i32
    %0 = arith.cmpi eq, %arg2, %c0_i32 : i32
    %1 = arith.extui %0 : i1 to i32
    %c0_i32_0 = arith.constant 0 : i32
    %2 = arith.cmpi ne, %1, %c0_i32_0 : i32
    scf.if %2 {
      %cst_10 = arith.constant 0.000000e+00 : f32
      %12 = vector.broadcast %cst_10 : f32 to vector<8x128xf32>
      %c0_11 = arith.constant 0 : index
      %c0_12 = arith.constant 0 : index
      %13 = vector.load %arg6[%c0_11, %c0_12] : memref<8x128xf32, #tpu.memory_space<vmem>>, vector<8x128xf32>
      tpu.vector_store %arg6[%c0_11, %c0_12], %12 {strides = array<i32>} : memref<8x128xf32, #tpu.memory_space<vmem>>, vector<8x128xf32>,
    } else {
    }
    %c0 = arith.constant 0 : index
    %c0_1 = arith.constant 0 : index
    %3 = vector.load %arg6[%c0, %c0_1] : memref<8x128xf32, #tpu.memory_space<vmem>>, vector<8x128xf32>
    %c0_2 = arith.constant 0 : index
    %c0_3 = arith.constant 0 : index
    %4 = vector.load %arg3[%c0_2, %c0_3] : memref<8x128xf32, #tpu.memory_space<vmem>>, vector<8x128xf32>
    %c0_4 = arith.constant 0 : index
    %c0_5 = arith.constant 0 : index
    %5 = vector.load %arg4[%c0_4, %c0_5] : memref<128x128xf32, #tpu.memory_space<vmem>>, vector<128x128xf32>
    %cst = arith.constant dense<0.000000e+00> : vector<8x128xf32>
    %6 = tpu.matmul %4, %5, %cst {dimension_numbers = #tpu.dot_dimension_numbers<[1], [0], [0], [1], [0, 0, 1, 1], [], []>} : vector<8x128xf32>, vector<128x128xf32>, vector<8x128xf32> -> vector<8x128xf32>
    %7 = arith.addf %3, %6 : vector<8x128xf32>
    %c0_6 = arith.constant 0 : index
    %c0_7 = arith.constant 0 : index
    %8 = vector.load %arg6[%c0_6, %c0_7] : memref<8x128xf32, #tpu.memory_space<vmem>>, vector<8x128xf32>
    tpu.vector_store %arg6[%c0_6, %c0_7], %7 {strides = array<i32>} : memref<8x128xf32, #tpu.memory_space<vmem>>, vector<8x128xf32>,
    %c0_i32_8 = arith.constant 0 : i32
    %9 = arith.cmpi eq, %arg2, %c0_i32_8 : i32
    %10 = arith.extui %9 : i1 to i32
    %c0_i32_9 = arith.constant 0 : i32
    %11 = arith.cmpi ne, %10, %c0_i32_9 : i32
    scf.if %11 {
      %c0_10 = arith.constant 0 : index
      %c0_11 = arith.constant 0 : index
      %12 = vector.load %arg6[%c0_10, %c0_11] : memref<8x128xf32, #tpu.memory_space<vmem>>, vector<8x128xf32>
      %cst_12 = arith.constant 2.500000e-01 : f32
      %13 = vector.broadcast %cst_12 : f32 to vector<8x128xf32>
      %14 = arith.mulf %12, %13 : vector<8x128xf32>
      %c0_13 = arith.constant 0 : index
      %c0_14 = arith.constant 0 : index
      %15 = vector.load %arg5[%c0_13, %c0_14] : memref<8x128xf32, #tpu.memory_space<vmem>>, vector<8x128xf32>
      tpu.vector_store %arg5[%c0_13, %c0_14], %14 {strides = array<i32>} : memref<8x128xf32, #tpu.memory_space<vmem>>, vector<8x128xf32>,
    } else {
    }
    return
  }
  func.func @transform_0(%arg0: i32, %arg1: i32, %arg2: i32) -> (i32, i32) {
    %c0_i32 = arith.constant 0 : i32
    return %arg0, %arg2 : i32, i32
  }
  func.func @transform_1(%arg0: i32, %arg1: i32, %arg2: i32) -> (i32, i32) {
    %c0_i32 = arith.constant 0 : i32
    return %arg2, %arg1 : i32, i32
  }
  func.func @transform_2(%arg0: i32, %arg1: i32, %arg2: i32) -> (i32, i32) {
    %c0_i32 = arith.constant 0 : i32
    return %arg0, %arg1 : i32, i32
  }
}

</mosaic_0001>

<bundles_post_ra>
// kernel: tpu_custom_call.1
= control target key start
LH: loop header
LB: loop body
LE: loop exit
PB: predicated region body
PF: predicated region fallthrough
CT: control target
= control target key end

     0   :  { %7 = vsyncpa [#allocation4], 0  ;;  %s377_s0 = inlined_call_operand.hbm [shape: f32[8,128], index: 0, kind: input, shape index: {}]   ;;  %s378_s1 = inlined_call_operand.hbm [shape: f32[128,128], index: 1, kind: input, shape index: {}]   ;;  %s379_s2 = inlined_call_operand.hbm [shape: f32[8,128], index: 2, kind: output, shape index: {}]  }
   0x1   :  { %8 = vsyncpa [#allocation7], 0 }
   0x2   :  { %9 = vsyncpa [#allocation5], 0  ;;  %s311_s9 = smov [#allocation3]   ;;  %s312_s11 = smov [#allocation6]  }
   0x3   :  { %s16_s10 = sshll.u32 %s311_s9, 4  ;;  %s25_s12 = sshll.u32 %s312_s11, 4  ;;  %s17_s10 = int_to_ptr.vmem [resolvable:$true] %s16_s10  ;;  %s334_s12 = int_to_ptr.vmem [resolvable:$true] %s25_s12 }
   0x4   :  { %s239_s15 = scalar_lea.hbm %s377_s0, 128 }
   0x5   :  { %p240_p0 = scmp.ne.s32.totalorder %s377_s0, %s239_s15  ;;  %p243_p1 = scmp.lt.u32.totalorder %s239_s15, %s377_s0 }
   0x7   :  { %p245_p2 = pnand %p243_p1, %p240_p0 }
   0x9   :  { %248 = shalt.err (!%p245_p2)
}
   0xa   :  { %s249_s20 = scalar_lea.vmem %s17_s10, 128  ;;  %p254_p4 = scmp.lt.s32.totalorder %s17_s10, %s17_s10 }
   0xb   :  { %p250_p3 = scmp.ne.s32.totalorder %s17_s10, %s249_s20  ;;  %p255_p5 = scmp.lt.s32.totalorder %s249_s20, %s249_s20 }
   0xd   :  { %p256_p6 = por %p255_p5, %p254_p4 }
   0xf   :  { %p257_p7 = pnand %p256_p6, %p250_p3 }
  0x11   :  { %260 = shalt.err (!%p257_p7)
}
  0x12   :  { %19 = dma.hbm_to_vmem [thread:$0]  %s377_s0, 128, %s17_s10, [#allocation4]  }
  0x13   :  { %s261_s25 = scalar_lea.hbm %s378_s1, 2048 }
  0x14   :  { %p262_p8 = scmp.ne.s32.totalorder %s378_s1, %s261_s25  ;;  %p265_p9 = scmp.lt.u32.totalorder %s261_s25, %s378_s1 }
  0x16   :  { %p267_p10 = pnand %p265_p9, %p262_p8 }
  0x18   :  { %270 = shalt.err (!%p267_p10)
}
  0x19   :  { %s271_s30 = scalar_lea.vmem %s334_s12, 2048  ;;  %p276_p12 = scmp.lt.s32.totalorder %s334_s12, %s334_s12 }
  0x1a   :  { %p272_p11 = scmp.ne.s32.totalorder %s334_s12, %s271_s30  ;;  %p277_p13 = scmp.lt.s32.totalorder %s271_s30, %s271_s30 }
  0x1c   :  { %p278_p0 = por %p277_p13, %p276_p12 }
  0x1e   :  { %p279_p1 = pnand %p278_p0, %p272_p11 }
  0x20   :  { %282 = shalt.err (!%p279_p1)
}
  0x21   :  { %s313_s0 = smov 128   ;;  %s314_s3 = smov 8  }
  0x22   :  { %31 = dma.hbm_to_vmem [thread:$0]  %s378_s1, 2048, %s334_s12, [#allocation7], %s313_s0, %s313_s0, %s314_s3  }
  0x23   :  { %305 = dma.done.wait [#allocation4], 128  }
  0x24   :  { %306 = vsyncadd [#allocation4], 4294967168 }
  0x25   :  { %307 = dma.done.wait [#allocation7], 2048  }
  0x26   :  { %308 = vsyncadd [#allocation7], 4294965248  ;;  %v315_v0 = vmov 0.0|0.0   ;;  %vm316_vm0 = vmmov 0   ;;  %v317_v1 = vmov 0.0   ;;  %v45_v2 = vld [vmem:[#allocation6] sm:$0xff] }
  0x27   :  { %207 = vmatprep.subr.bf16.mxu0 %v315_v0  ;;  %204 = vmatprep.mubr.msk.f32.mxu0 %vm316_vm0, %v317_v1  ;;  %v46_v3 = vld [vmem:[#allocation6 + $0x8] sm:$0xff]  ;;  %v47_v4 = vld [vmem:[#allocation6 + $0x10] sm:$0xff]  ;;  %v48_v6 = vld [vmem:[#allocation6 + $0x18] sm:$0xff]  ;;  %s318_s1 = smov [#allocation8]  }
  0x28   :  { %v208_v5 = vpack.c.bf16 %v46_v3, %v45_v2  ;;  %v211_v7 = vpack.c.bf16 %v48_v6, %v47_v4  ;;  %v49_v8 = vld [vmem:[#allocation6 + $0x20] sm:$0xff]  ;;  %v50_v9 = vld [vmem:[#allocation6 + $0x28] sm:$0xff]  ;;  %v51_v11 = vld [vmem:[#allocation6 + $0x30] sm:$0xff]  ;;  %s145_s6 = sshll.u32 %s318_s1, 4  ;;  %s146_s6 = int_to_ptr.vmem [resolvable:$true] %s145_s6 }
  0x29   :  { %v214_v10 = vpack.c.bf16 %v50_v9, %v49_v8  ;;  %v52_v12 = vld [vmem:[#allocation6 + $0x38] sm:$0xff]  ;;  %v53_v14 = vld [vmem:[#allocation6 + $0x40] sm:$0xff]  ;;  %v54_v15 = vld [vmem:[#allocation6 + $0x48] sm:$0xff]  ;;  %s283_s7 = scalar_lea.vmem %s146_s6, 128  ;;  %p288_p3 = scmp.lt.s32.totalorder %s146_s6, %s146_s6 }
  0x2a   :  { %209 = vmatpush3.bf16.msra.mxu0 %v208_v5  ;;  %v217_v13 = vpack.c.bf16 %v52_v12, %v51_v11  ;;  %v220_v16 = vpack.c.bf16 %v54_v15, %v53_v14  ;;  %v55_v17 = vld [vmem:[#allocation6 + $0x50] sm:$0xff]  ;;  %v56_v18 = vld [vmem:[#allocation6 + $0x58] sm:$0xff]  ;;  %v57_v20 = vld [vmem:[#allocation6 + $0x60] sm:$0xff]  ;;  %p284_p2 = scmp.ne.s32.totalorder %s146_s6, %s283_s7  ;;  %p289_p4 = scmp.lt.s32.totalorder %s283_s7, %s283_s7 }
  0x2b   :  { %210 = vmatprep.subr.bf16.mxu0 %v315_v0  ;;  %v223_v19 = vpack.c.bf16 %v56_v18, %v55_v17  ;;  %v58_v21 = vld [vmem:[#allocation6 + $0x68] sm:$0xff]  ;;  %v59_v23 = vld [vmem:[#allocation6 + $0x70] sm:$0xff]  ;;  %v60_v24 = vld [vmem:[#allocation6 + $0x78] sm:$0xff] }
  0x2c   :  { %v226_v22 = vpack.c.bf16 %v58_v21, %v57_v20  ;;  %v229_v25 = vpack.c.bf16 %v60_v24, %v59_v23  ;;  %v44_v26 = vld [vmem:[#allocation3] sm:$0xff]  ;;  %p290_p5 = por %p289_p4, %p288_p3 }
  0x2e   :  { %212 = vmatpush3.bf16.msra.mxu0 %v211_v7  ;;  %p291_p6 = pnand %p290_p5, %p284_p2 }
  0x2f   :  { %213 = vmatprep.subr.bf16.mxu0 %v315_v0 }
  0x32   :  { %215 = vmatpush3.bf16.msra.mxu0 %v214_v10 }
  0x33   :  { %216 = vmatprep.subr.bf16.mxu0 %v315_v0 }
  0x36   :  { %218 = vmatpush3.bf16.msra.mxu0 %v217_v13 }
  0x37   :  { %219 = vmatprep.subr.bf16.mxu0 %v315_v0 }
  0x3a   :  { %221 = vmatpush3.bf16.msra.mxu0 %v220_v16 }
  0x3b   :  { %222 = vmatprep.subr.bf16.mxu0 %v315_v0 }
  0x3e   :  { %224 = vmatpush3.bf16.msra.mxu0 %v223_v19 }
  0x3f   :  { %225 = vmatprep.subr.bf16.mxu0 %v315_v0 }
  0x42   :  { %227 = vmatpush3.bf16.msra.mxu0 %v226_v22 }
  0x43   :  { %228 = vmatprep.subr.bf16.mxu0 %v315_v0 }
  0x46   :  { %230 = vmatpush3.bf16.msra.mxu0 %v229_v25 }
  0x49   :  { %205 = vmatmul.mubr.f32.vlgmr.msra.gmra.mrb[0].mxu0 %v44_v26 }
 0x11c   :  { %v127_v27 = vpop.f32.mrb[0].mxu0 }
 0x11d   :  { %v137_v28 = vmul.f32 0.25, %v127_v27  ;;  %v206_v29 = vpop.f32.mrb[1].mxu0 }
 0x11f   :  { %138 = vst [vmem:[#allocation8] sm:$0xff] %v137_v28 }
 0x120   :  { %294 = shalt.err (!%p291_p6)
}
 0x121   :  { %s295_s10 = scalar_lea.hbm %s379_s2, 128 }
 0x122   :  { %p296_p7 = scmp.ne.s32.totalorder %s379_s2, %s295_s10  ;;  %p299_p8 = scmp.lt.u32.totalorder %s295_s10, %s379_s2 }
 0x124   :  { %p301_p9 = pnand %p299_p8, %p296_p7 }
 0x126   :  { %304 = shalt.err (!%p301_p9)
}
 0x127   :  { %148 = dma.vmem_to_hbm [thread:$0]  %s146_s6, 128, %s379_s2, [#allocation5]  }
 0x128   :  { %309 = dma.done.wait [#allocation5], 128  }
 0x129   :  { %310 = vsyncadd [#allocation5], 4294967168 }
 0x12a   :  { %152 = vsyncpa [#allocation4], 1 }
 0x12b   :  { %153 = vsyncpa [#allocation7], 1 }
 0x12c   :  { %154 = vsyncpa [#allocation5], 1 }

</bundles_post_ra>
